<compile_context>
chip_gen: v5e
topology: v5e:2x2
jax: 0.10.0
libtpu: 0.0.40
codegen_flags: <defaults>
</compile_context>

<pallas_src>
import jax
import jax.numpy as jnp
from jax.experimental import pallas as pl
from jax.experimental.pallas import tpu as pltpu


def _decoder2_kernel(ids_ref, h_ref, eproj_ref, encih_ref, v_ref,
                     whf_ref, bih_ref, bhh_ref, wfc_ref, bfc_ref, embih_hbm,
                     pred_ref, hout_ref,
                     h_sc, gi_emb_sc, sem):
    B, H = h_ref.shape

    # ---- grid step 0: attention + GRU step (result carried in VMEM scratch) ----
    @pl.when(pl.program_id(0) == 0)
    def _():
        # Start B row-gather DMAs of the pre-folded embedding->gate table
        # (emb_ih lives in HBM); they overlap the matmul/attention work below.
        for b in range(B):
            row = ids_ref[b]                       # scalar int32 from SMEM
            pltpu.make_async_copy(embih_hbm.at[pl.ds(row, 1), :],
                                  gi_emb_sc.at[pl.ds(b, 1), :],
                                  sem.at[b]).start()

        h = h_ref[...]                             # (B, H)

        # fused hidden-state matmul: h @ [W_attn_h | W_hh^T] -> (B, 4H)
        hf = jnp.dot(h, whf_ref[...], preferred_element_type=jnp.float32)
        h_proj = hf[:, 0:H]                        # attention hidden projection
        gh = hf[:, H:4 * H] + bhh_ref[...]         # GRU hidden gates (B, 3H)

        # additive attention; encoder projection precomputed, scores on the VPU
        energy = jnp.tanh(eproj_ref[...] + h_proj[:, None, :])      # (B, S, H)
        scores = jnp.sum(energy * v_ref[...], axis=-1)               # (B, S)
        m = jnp.max(scores, axis=-1, keepdims=True)
        p = jnp.exp(scores - m)
        attn = p / jnp.sum(p, axis=-1, keepdims=True)                # (B, S)

        # context folded into gate space: attn @ (enc @ W_ih_c^T) -> (B, 3H)
        gi_ctx = jnp.einsum('bks,bsh->bkh', attn[:, None, :], encih_ref[...],
                            preferred_element_type=jnp.float32)[:, 0, :]

        # wait for the embedding-gate gather
        for b in range(B):
            pltpu.make_async_copy(embih_hbm.at[pl.ds(0, 1), :],
                                  gi_emb_sc.at[pl.ds(b, 1), :],
                                  sem.at[b]).wait()

        # GRU single step (PyTorch gate order r, z, n; b_hh already in gh)
        gi = gi_emb_sc[...] + gi_ctx + bih_ref[...]                  # (B, 3H)
        i_r, i_z, i_n = gi[:, 0:H], gi[:, H:2 * H], gi[:, 2 * H:3 * H]
        h_r, h_z, h_n = gh[:, 0:H], gh[:, H:2 * H], gh[:, 2 * H:3 * H]
        r = jax.nn.sigmoid(i_r + h_r)
        z = jax.nn.sigmoid(i_z + h_z)
        n = jnp.tanh(i_n + r * h_n)
        h_new = (1.0 - z) * n + z * h                                # (B, H)

        h_sc[...] = h_new
        hout_ref[...] = h_new

    # ---- every grid step: one lane-dense V tile of the output projection ----
    pred_ref[...] = (jnp.dot(h_sc[...], wfc_ref[...],
                             preferred_element_type=jnp.float32)
                     + bfc_ref[...])


def init_decoder2_params(key, vocab_size, emb_size, hidden_size):
    """Deterministic parameter init mirroring the PyTorch module's shapes."""
    ks = jax.random.split(key, 10)
    H, E, V = hidden_size, emb_size, vocab_size

    def u(k, shape, scale):
        return jax.random.uniform(k, shape, jnp.float32, -scale, scale)

    emb = jax.random.normal(ks[0], (V, E), jnp.float32)
    emb = emb.at[0].set(0.0)                          # padding_idx=0 -> zero row

    k_attn = 1.0 / jnp.sqrt(3.0 * H)
    k_gru = 1.0 / jnp.sqrt(1.0 * H)
    k_fc = 1.0 / jnp.sqrt(1.0 * H)

    return {
        'embedding': emb,                                            # (V, E)
        'attn_w': u(ks[1], (H, 3 * H), k_attn),                      # Linear(3H -> H)
        'attn_b': u(ks[2], (H,), k_attn),
        'v_w': u(ks[3], (1, H), k_gru),                              # Linear(H -> 1), no bias
        'w_ih': u(ks[4], (3 * H, E + 2 * H), k_gru),                 # GRU weight_ih_l0
        'w_hh': u(ks[5], (3 * H, H), k_gru),                         # GRU weight_hh_l0
        'b_ih': u(ks[6], (3 * H,), k_gru),
        'b_hh': u(ks[7], (3 * H,), k_gru),
        'fc_w': u(ks[8], (V, H), k_fc),                              # Linear(H -> V)
        'fc_b': u(ks[9], (V,), k_fc),
    }


def prepare_decoder2(params):
    """One-time weight preparation (hoisted out of the per-step path)."""
    V, E = params['embedding'].shape
    H = params['w_hh'].shape[1]

    w_attn = params['attn_w']                           # (H, 3H)
    w_attn_h = jnp.transpose(w_attn[:, :H])             # (H, H)   acts on hidden
    w_attn_e = jnp.transpose(w_attn[:, H:])             # (2H, H)  acts on encoder outs
    w_hh_t = jnp.transpose(params['w_hh'])              # (H, 3H)
    w_h_fused = jnp.concatenate([w_attn_h, w_hh_t], axis=1)   # (H, 4H)

    w_ih = params['w_ih']                               # (3H, E + 2H)
    w_ih_e_t = jnp.transpose(w_ih[:, :E])               # (E, 3H)
    w_ih_c_t = jnp.transpose(w_ih[:, E:])               # (2H, 3H)

    # embedding folded into gate space (padding row stays exactly zero)
    emb_ih = jnp.dot(params['embedding'], w_ih_e_t)     # (V, 3H)

    return {
        'emb_ih': emb_ih,                               # (V, 3H), stays in HBM
        'w_attn_e': w_attn_e,                           # (2H, H)
        'b_attn': params['attn_b'].reshape(1, 1, H),
        'v_b': params['v_w'].reshape(1, 1, H),
        'w_h_fused': w_h_fused,                         # (H, 4H)
        'w_ih_c_t': w_ih_c_t,                           # (2H, 3H)
        'b_ih': params['b_ih'].reshape(1, 3 * H),
        'b_hh': params['b_hh'].reshape(1, 3 * H),
        'w_fc_t': jnp.transpose(params['fc_w']),        # (H, V)
        'b_fc': params['fc_b'].reshape(1, V),
    }


def precompute_encoder(encoder_outputs, prep):
    """Step-invariant per-sequence precomputes: attention & gate-space projections."""
    enc = encoder_outputs.astype(jnp.float32)
    enc_proj = jnp.einsum('bsd,dh->bsh', enc, prep['w_attn_e']) + prep['b_attn']
    enc_ih = jnp.einsum('bsd,dh->bsh', enc, prep['w_ih_c_t'])    # (B, S, 3H)
    return enc_proj, enc_ih


def _pick_tile_v(V):
    if V <= 512:
        return V
    for t in (512, 256):
        if V % t == 0:
            return t
    return 256   # partial last tile is masked by Pallas on writeback


def decoder2_forward(x, hidden, encoder_outputs, params, *,
                     prep=None, enc_proj=None, enc_ih=None):
    """Pallas-backed equivalent of Decoder2.forward.

    `prep` / (`enc_proj`, `enc_ih`) can be precomputed once per model / per
    source sequence and reused across decode steps.
    """
    if prep is None:
        prep = prepare_decoder2(params)
    if enc_proj is None or enc_ih is None:
        enc_proj, enc_ih = precompute_encoder(encoder_outputs, prep)

    B = x.shape[0]
    H = hidden.shape[-1]
    V = prep['w_fc_t'].shape[1]
    S = enc_proj.shape[1]

    tile_v = _pick_tile_v(V)
    n_v = pl.cdiv(V, tile_v)

    def full(shape):
        n = len(shape)
        return pl.BlockSpec(shape, lambda j, ids, n=n: (0,) * n)

    grid_spec = pltpu.PrefetchScalarGridSpec(
        num_scalar_prefetch=1,                  # token ids -> SMEM
        grid=(n_v,),
        in_specs=[
            full((B, H)),                       # hidden
            full((B, S, H)),                    # enc_proj
            full((B, S, 3 * H)),                # enc_ih
            full((1, 1, H)),                    # v (score weights)
            full((H, 4 * H)),                   # fused [W_attn_h | W_hh^T]
            full((1, 3 * H)),                   # b_ih
            full((1, 3 * H)),                   # b_hh
            pl.BlockSpec((H, tile_v), lambda j, ids: (0, j)),   # w_fc_t tile
            pl.BlockSpec((1, tile_v), lambda j, ids: (0, j)),   # b_fc tile
            pl.BlockSpec(memory_space=pl.ANY),  # emb_ih table stays in HBM
        ],
        out_specs=[
            pl.BlockSpec((B, tile_v), lambda j, ids: (0, j)),   # prediction tile
            pl.BlockSpec((B, H), lambda j, ids: (0, 0)),        # new hidden
        ],
        scratch_shapes=[
            pltpu.VMEM((B, H), jnp.float32),        # carried GRU state
            pltpu.VMEM((B, 3 * H), jnp.float32),    # gathered embedding gates
            pltpu.SemaphoreType.DMA((B,)),          # per-row gather semaphores
        ],
    )

    pred, h_new = pl.pallas_call(
        _decoder2_kernel,
        out_shape=(jax.ShapeDtypeStruct((B, V), jnp.float32),
                   jax.ShapeDtypeStruct((B, H), jnp.float32)),
        grid_spec=grid_spec,
        compiler_params=pltpu.CompilerParams(
            dimension_semantics=("arbitrary",),     # scratch carries across V tiles
            vmem_limit_bytes=32 * 1024 * 1024),
    )(
        x.astype(jnp.int32),                        # (B,) token ids (scalar prefetch)
        hidden[0].astype(jnp.float32),              # (B, H)
        enc_proj.astype(jnp.float32),               # (B, S, H)
        enc_ih.astype(jnp.float32),                 # (B, S, 3H)
        prep['v_b'], prep['w_h_fused'], prep['b_ih'], prep['b_hh'],
        prep['w_fc_t'], prep['b_fc'],
        prep['emb_ih'],
    )
    return pred, h_new[None, :, :]                  # hidden back to (1, B, H)


def decoder2_reference(x, hidden, encoder_outputs, params):
    """Pure-JAX reference mirroring the PyTorch forward (for a sanity check)."""
    B = x.shape[0]
    H = hidden.shape[-1]
    S = encoder_outputs.shape[1]

    embedded = params['embedding'][x]                                # (B, E)
    h = hidden[0]                                                    # (B, H)

    h_rep = jnp.broadcast_to(h[:, None, :], (B, S, H))
    combined = jnp.concatenate([h_rep, encoder_outputs], axis=2)     # (B, S, 3H)
    energy = jnp.tanh(combined @ params['attn_w'].T + params['attn_b'])
    scores = (energy @ params['v_w'].T)[..., 0]                      # (B, S)
    attn = jax.nn.softmax(scores, axis=1)

    context = jnp.einsum('bs,bsd->bd', attn, encoder_outputs)        # (B, 2H)
    rnn_in = jnp.concatenate([embedded, context], axis=1)            # (B, E+2H)

    gi = rnn_in @ params['w_ih'].T + params['b_ih']
    gh = h @ params['w_hh'].T + params['b_hh']
    i_r, i_z, i_n = gi[:, :H], gi[:, H:2 * H], gi[:, 2 * H:]
    h_r, h_z, h_n = gh[:, :H], gh[:, H:2 * H], gh[:, 2 * H:]
    r = jax.nn.sigmoid(i_r + h_r)
    z = jax.nn.sigmoid(i_z + h_z)
    n = jnp.tanh(i_n + r * h_n)
    h_new = (1.0 - z) * n + z * h

    pred = h_new @ params['fc_w'].T + params['fc_b']
    return pred, h_new[None, :, :]


if __name__ == "__main__":
    B, S = 2, 8
    vocab_size, emb_size, hidden_size = 32, 16, 32

    key = jax.random.PRNGKey(0)
    k_p, k_x, k_h, k_e = jax.random.split(key, 4)

    params = init_decoder2_params(k_p, vocab_size, emb_size, hidden_size)
    x = jax.random.randint(k_x, (B,), 0, vocab_size, dtype=jnp.int32)
    hidden = jax.random.normal(k_h, (1, B, hidden_size), jnp.float32)
    encoder_outputs = jax.random.normal(k_e, (B, S, 2 * hidden_size), jnp.float32)

    # Hoist one-time weight prep and the step-invariant encoder projections
    # (in a real decode loop these are reused across every step).
    prep = prepare_decoder2(params)
    enc_proj, enc_ih = precompute_encoder(encoder_outputs, prep)

    pred, h_new = decoder2_forward(x, hidden, encoder_outputs, params,
                                   prep=prep, enc_proj=enc_proj, enc_ih=enc_ih)
    jax.block_until_ready((pred, h_new))

    pred_ref, h_ref = decoder2_reference(x, hidden, encoder_outputs, params)
    assert pred.shape == (B, vocab_size) and h_new.shape == (1, B, hidden_size)
    assert jnp.allclose(pred, pred_ref, atol=1e-4, rtol=1e-4)
    assert jnp.allclose(h_new, h_ref, atol=1e-4, rtol=1e-4)

    print("KERNEL_OK")
</pallas_src>

<mosaic_0001>
module attributes {stable_mosaic.version = 11 : i64} {
  func.func @_decoder2_kernel(%arg0: i32, %arg1: memref<2xi32, #tpu.memory_space<smem>>, %arg2: memref<2x32xf32, #tpu.memory_space<vmem>>, %arg3: memref<2x8x32xf32, #tpu.memory_space<vmem>>, %arg4: memref<2x8x96xf32, #tpu.memory_space<vmem>>, %arg5: memref<1x1x32xf32, #tpu.memory_space<vmem>>, %arg6: memref<32x128xf32, #tpu.memory_space<vmem>>, %arg7: memref<1x96xf32, #tpu.memory_space<vmem>>, %arg8: memref<1x96xf32, #tpu.memory_space<vmem>>, %arg9: memref<32x32xf32, #tpu.memory_space<vmem>>, %arg10: memref<1x32xf32, #tpu.memory_space<vmem>>, %arg11: memref<32x96xf32, #tpu.memory_space<any>>, %arg12: memref<2x32xf32, #tpu.memory_space<vmem>>, %arg13: memref<2x32xf32, #tpu.memory_space<vmem>>, %arg14: memref<2x32xf32, #tpu.memory_space<vmem>>, %arg15: memref<2x96xf32, #tpu.memory_space<vmem>>, %arg16: memref<2x!tpu.dma_semaphore, #tpu.memory_space<semaphore_mem>>) attributes {dimension_semantics = [#tpu.dimension_semantics<arbitrary>], iteration_bounds = array<i64: 1>, scalar_prefetch = 1 : i64, scratch_operands = 3 : i64, tpu.core_type = #tpu.core_type<tc>, window_params = [{pipeline_mode = #tpu.pipeline_mode<synchronous>, transform_indices = @transform_0, window_bounds = array<i64: 2, 32>}, {pipeline_mode = #tpu.pipeline_mode<synchronous>, transform_indices = @transform_1, window_bounds = array<i64: 2, 8, 32>}, {pipeline_mode = #tpu.pipeline_mode<synchronous>, transform_indices = @transform_2, window_bounds = array<i64: 2, 8, 96>}, {pipeline_mode = #tpu.pipeline_mode<synchronous>, transform_indices = @transform_3, window_bounds = array<i64: 1, 1, 32>}, {pipeline_mode = #tpu.pipeline_mode<synchronous>, transform_indices = @transform_4, window_bounds = array<i64: 32, 128>}, {pipeline_mode = #tpu.pipeline_mode<synchronous>, transform_indices = @transform_5, window_bounds = array<i64: 1, 96>}, {pipeline_mode = #tpu.pipeline_mode<synchronous>, transform_indices = @transform_6, window_bounds = array<i64: 1, 96>}, {transform_indices = @transform_7, window_bounds = array<i64: 32, 32>}, {transform_indices = @transform_8, window_bounds = array<i64: 1, 32>}, {}, {transform_indices = @transform_10, window_bounds = array<i64: 2, 32>}, {pipeline_mode = #tpu.pipeline_mode<synchronous>, transform_indices = @transform_11, window_bounds = array<i64: 2, 32>}]} {
    %c0_i32 = arith.constant 0 : i32
    %0 = arith.cmpi eq, %arg0, %c0_i32 : i32
    %1 = arith.extui %0 : i1 to i32
    %c0_i32_0 = arith.constant 0 : i32
    %2 = arith.cmpi ne, %1, %c0_i32_0 : i32
    scf.if %2 {
      %c0_8 = arith.constant 0 : index
      %10 = memref.load %arg1[%c0_8] : memref<2xi32, #tpu.memory_space<smem>>
      %c0_i32_9 = arith.constant 0 : i32
      %c0_i32_10 = arith.constant 0 : i32
      %11 = tpu.memref_slice %arg11[%10, %c0_i32_10] : memref<32x96xf32, #tpu.memory_space<any>> -> memref<1x96xf32, #tpu.memory_space<any>>
      %c0_i32_11 = arith.constant 0 : i32
      %c0_i32_12 = arith.constant 0 : i32
      %12 = tpu.memref_slice %arg15[%c0_i32_11, %c0_i32_12] : memref<2x96xf32, #tpu.memory_space<vmem>> -> memref<1x96xf32, #tpu.memory_space<vmem>>
      %13 = tpu.memref_slice %arg16[%c0_i32_9] : memref<2x!tpu.dma_semaphore, #tpu.memory_space<semaphore_mem>> -> memref<1x!tpu.dma_semaphore, #tpu.memory_space<semaphore_mem>>
      %14 = tpu.memref_squeeze %13 : memref<1x!tpu.dma_semaphore, #tpu.memory_space<semaphore_mem>> -> memref<!tpu.dma_semaphore, #tpu.memory_space<semaphore_mem>>
      tpu.enqueue_dma source(%11 : memref<1x96xf32, #tpu.memory_space<any>>) target(%12 : memref<1x96xf32, #tpu.memory_space<vmem>>) target_semaphore(%14 : memref<!tpu.dma_semaphore, #tpu.memory_space<semaphore_mem>>)
      %c1 = arith.constant 1 : index
      %15 = memref.load %arg1[%c1] : memref<2xi32, #tpu.memory_space<smem>>
      %c1_i32 = arith.constant 1 : i32
      %c0_i32_13 = arith.constant 0 : i32
      %16 = tpu.memref_slice %arg11[%15, %c0_i32_13] : memref<32x96xf32, #tpu.memory_space<any>> -> memref<1x96xf32, #tpu.memory_space<any>>
      %c1_i32_14 = arith.constant 1 : i32
      %c0_i32_15 = arith.constant 0 : i32
      %17 = tpu.memref_slice %arg15[%c1_i32_14, %c0_i32_15] : memref<2x96xf32, #tpu.memory_space<vmem>> -> memref<1x96xf32, #tpu.memory_space<vmem>>
      %18 = tpu.memref_slice %arg16[%c1_i32] : memref<2x!tpu.dma_semaphore, #tpu.memory_space<semaphore_mem>> -> memref<1x!tpu.dma_semaphore, #tpu.memory_space<semaphore_mem>>
      %19 = tpu.memref_squeeze %18 : memref<1x!tpu.dma_semaphore, #tpu.memory_space<semaphore_mem>> -> memref<!tpu.dma_semaphore, #tpu.memory_space<semaphore_mem>>
      tpu.enqueue_dma source(%16 : memref<1x96xf32, #tpu.memory_space<any>>) target(%17 : memref<1x96xf32, #tpu.memory_space<vmem>>) target_semaphore(%19 : memref<!tpu.dma_semaphore, #tpu.memory_space<semaphore_mem>>)
      %c0_16 = arith.constant 0 : index
      %c0_17 = arith.constant 0 : index
      %20 = vector.load %arg2[%c0_16, %c0_17] : memref<2x32xf32, #tpu.memory_space<vmem>>, vector<2x32xf32>
      %c0_18 = arith.constant 0 : index
      %c0_19 = arith.constant 0 : index
      %21 = vector.load %arg6[%c0_18, %c0_19] : memref<32x128xf32, #tpu.memory_space<vmem>>, vector<32x128xf32>
      %cst_20 = arith.constant dense<0.000000e+00> : vector<2x128xf32>
      %22 = tpu.matmul %20, %21, %cst_20 {dimension_numbers = #tpu.dot_dimension_numbers<[1], [0], [0], [1], [0, 0, 1, 1], [], []>} : vector<2x32xf32>, vector<32x128xf32>, vector<2x128xf32> -> vector<2x128xf32>
      %23 = vector.extract_strided_slice %22 {offsets = [0, 0], sizes = [2, 32], strides = [1, 1]} : vector<2x128xf32> to vector<2x32xf32>
      %24 = vector.extract_strided_slice %22 {offsets = [0, 32], sizes = [2, 96], strides = [1, 1]} : vector<2x128xf32> to vector<2x96xf32>
      %c0_21 = arith.constant 0 : index
      %c0_22 = arith.constant 0 : index
      %25 = vector.load %arg8[%c0_21, %c0_22] : memref<1x96xf32, #tpu.memory_space<vmem>>, vector<1x96xf32>
      %26 = vector.broadcast %25 : vector<1x96xf32> to vector<2x96xf32>
      %27 = arith.addf %24, %26 : vector<2x96xf32>
      %c0_23 = arith.constant 0 : index
      %c0_24 = arith.constant 0 : index
      %c0_25 = arith.constant 0 : index
      %28 = vector.load %arg3[%c0_23, %c0_24, %c0_25] : memref<2x8x32xf32, #tpu.memory_space<vmem>>, vector<2x8x32xf32>
      %29 = vector.shape_cast %23 : vector<2x32xf32> to vector<2x1x32xf32>
      %30 = vector.broadcast %29 : vector<2x1x32xf32> to vector<2x8x32xf32>
      %31 = arith.addf %28, %30 : vector<2x8x32xf32>
      %32 = math.tanh %31 : vector<2x8x32xf32>
      %c0_26 = arith.constant 0 : index
      %c0_27 = arith.constant 0 : index
      %c0_28 = arith.constant 0 : index
      %33 = vector.load %arg5[%c0_26, %c0_27, %c0_28] : memref<1x1x32xf32, #tpu.memory_space<vmem>>, vector<1x1x32xf32>
      %34 = vector.broadcast %33 : vector<1x1x32xf32> to vector<2x8x32xf32>
      %35 = arith.mulf %32, %34 : vector<2x8x32xf32>
      %cst_29 = arith.constant dense<0.000000e+00> : vector<2x8xf32>
      %36 = vector.multi_reduction <add>, %35, %cst_29 [2] : vector<2x8x32xf32> to vector<2x8xf32>
      %cst_30 = arith.constant dense<0xFF800000> : vector<2xf32>
      %37 = vector.multi_reduction <maximumf>, %36, %cst_30 [1] : vector<2x8xf32> to vector<2xf32>
      %38 = vector.shape_cast %37 : vector<2xf32> to vector<2x1xf32>
      %39 = vector.broadcast %38 : vector<2x1xf32> to vector<2x8xf32>
      %40 = arith.subf %36, %39 : vector<2x8xf32>
      %41 = math.exp %40 : vector<2x8xf32>
      %cst_31 = arith.constant dense<0.000000e+00> : vector<2xf32>
      %42 = vector.multi_reduction <add>, %41, %cst_31 [1] : vector<2x8xf32> to vector<2xf32>
      %43 = vector.shape_cast %42 : vector<2xf32> to vector<2x1xf32>
      %44 = vector.broadcast %43 : vector<2x1xf32> to vector<2x8xf32>
      %45 = arith.divf %41, %44 : vector<2x8xf32>
      %46 = vector.shape_cast %45 : vector<2x8xf32> to vector<2x1x8xf32>
      %c0_32 = arith.constant 0 : index
      %c0_33 = arith.constant 0 : index
      %c0_34 = arith.constant 0 : index
      %47 = vector.load %arg4[%c0_32, %c0_33, %c0_34] : memref<2x8x96xf32, #tpu.memory_space<vmem>>, vector<2x8x96xf32>
      "tpu.trace_start"() <{level = 10 : i32, message = "bks,bsh->bkh"}> : () -> ()
      %cst_35 = arith.constant dense<0.000000e+00> : vector<2x1x96xf32>
      %48 = tpu.matmul %46, %47, %cst_35 {dimension_numbers = #tpu.dot_dimension_numbers<[2], [1], [1], [2], [0, 0, 0, 1, 1, 2], [0], [0]>} : vector<2x1x8xf32>, vector<2x8x96xf32>, vector<2x1x96xf32> -> vector<2x1x96xf32>
      "tpu.trace_stop"() : () -> ()
      %49 = vector.shape_cast %48 : vector<2x1x96xf32> to vector<2x96xf32>
      %c0_i32_36 = arith.constant 0 : i32
      %c0_i32_37 = arith.constant 0 : i32
      %c0_i32_38 = arith.constant 0 : i32
      %50 = tpu.memref_slice %arg11[%c0_i32_37, %c0_i32_38] : memref<32x96xf32, #tpu.memory_space<any>> -> memref<1x96xf32, #tpu.memory_space<any>>
      %c0_i32_39 = arith.constant 0 : i32
      %c0_i32_40 = arith.constant 0 : i32
      %51 = tpu.memref_slice %arg15[%c0_i32_39, %c0_i32_40] : memref<2x96xf32, #tpu.memory_space<vmem>> -> memref<1x96xf32, #tpu.memory_space<vmem>>
      %52 = tpu.memref_slice %arg16[%c0_i32_36] : memref<2x!tpu.dma_semaphore, #tpu.memory_space<semaphore_mem>> -> memref<1x!tpu.dma_semaphore, #tpu.memory_space<semaphore_mem>>
      %53 = tpu.memref_squeeze %52 : memref<1x!tpu.dma_semaphore, #tpu.memory_space<semaphore_mem>> -> memref<!tpu.dma_semaphore, #tpu.memory_space<semaphore_mem>>
      tpu.wait_dma2 semaphore(%53 : memref<!tpu.dma_semaphore, #tpu.memory_space<semaphore_mem>>) src(%50 : memref<1x96xf32, #tpu.memory_space<any>>) dst(%51 : memref<1x96xf32, #tpu.memory_space<vmem>>)
      %c1_i32_41 = arith.constant 1 : i32
      %c0_i32_42 = arith.constant 0 : i32
      %c0_i32_43 = arith.constant 0 : i32
      %54 = tpu.memref_slice %arg11[%c0_i32_42, %c0_i32_43] : memref<32x96xf32, #tpu.memory_space<any>> -> memref<1x96xf32, #tpu.memory_space<any>>
      %c1_i32_44 = arith.constant 1 : i32
      %c0_i32_45 = arith.constant 0 : i32
      %55 = tpu.memref_slice %arg15[%c1_i32_44, %c0_i32_45] : memref<2x96xf32, #tpu.memory_space<vmem>> -> memref<1x96xf32, #tpu.memory_space<vmem>>
      %56 = tpu.memref_slice %arg16[%c1_i32_41] : memref<2x!tpu.dma_semaphore, #tpu.memory_space<semaphore_mem>> -> memref<1x!tpu.dma_semaphore, #tpu.memory_space<semaphore_mem>>
      %57 = tpu.memref_squeeze %56 : memref<1x!tpu.dma_semaphore, #tpu.memory_space<semaphore_mem>> -> memref<!tpu.dma_semaphore, #tpu.memory_space<semaphore_mem>>
      tpu.wait_dma2 semaphore(%57 : memref<!tpu.dma_semaphore, #tpu.memory_space<semaphore_mem>>) src(%54 : memref<1x96xf32, #tpu.memory_space<any>>) dst(%55 : memref<1x96xf32, #tpu.memory_space<vmem>>)
      %c0_46 = arith.constant 0 : index
      %c0_47 = arith.constant 0 : index
      %58 = vector.load %arg15[%c0_46, %c0_47] : memref<2x96xf32, #tpu.memory_space<vmem>>, vector<2x96xf32>
      %59 = arith.addf %58, %49 : vector<2x96xf32>
      %c0_48 = arith.constant 0 : index
      %c0_49 = arith.constant 0 : index
      %60 = vector.load %arg7[%c0_48, %c0_49] : memref<1x96xf32, #tpu.memory_space<vmem>>, vector<1x96xf32>
      %61 = vector.broadcast %60 : vector<1x96xf32> to vector<2x96xf32>
      %62 = arith.addf %59, %61 : vector<2x96xf32>
      %63 = vector.extract_strided_slice %62 {offsets = [0, 0], sizes = [2, 32], strides = [1, 1]} : vector<2x96xf32> to vector<2x32xf32>
      %64 = vector.extract_strided_slice %62 {offsets = [0, 32], sizes = [2, 32], strides = [1, 1]} : vector<2x96xf32> to vector<2x32xf32>
      %65 = vector.extract_strided_slice %62 {offsets = [0, 64], sizes = [2, 32], strides = [1, 1]} : vector<2x96xf32> to vector<2x32xf32>
      %66 = vector.extract_strided_slice %27 {offsets = [0, 0], sizes = [2, 32], strides = [1, 1]} : vector<2x96xf32> to vector<2x32xf32>
      %67 = vector.extract_strided_slice %27 {offsets = [0, 32], sizes = [2, 32], strides = [1, 1]} : vector<2x96xf32> to vector<2x32xf32>
      %68 = vector.extract_strided_slice %27 {offsets = [0, 64], sizes = [2, 32], strides = [1, 1]} : vector<2x96xf32> to vector<2x32xf32>
      %69 = arith.addf %63, %66 : vector<2x32xf32>
      %70 = arith.negf %69 : vector<2x32xf32>
      %71 = math.exp %70 : vector<2x32xf32>
      %cst_50 = arith.constant 1.000000e+00 : f32
      %72 = vector.broadcast %cst_50 : f32 to vector<2x32xf32>
      %73 = arith.addf %72, %71 : vector<2x32xf32>
      %74 = arith.divf %72, %73 : vector<2x32xf32>
      %75 = arith.addf %64, %67 : vector<2x32xf32>
      %76 = arith.negf %75 : vector<2x32xf32>
      %77 = math.exp %76 : vector<2x32xf32>
      %cst_51 = arith.constant 1.000000e+00 : f32
      %78 = vector.broadcast %cst_51 : f32 to vector<2x32xf32>
      %79 = arith.addf %78, %77 : vector<2x32xf32>
      %80 = arith.divf %78, %79 : vector<2x32xf32>
      %81 = arith.mulf %74, %68 : vector<2x32xf32>
      %82 = arith.addf %65, %81 : vector<2x32xf32>
      %83 = math.tanh %82 : vector<2x32xf32>
      %cst_52 = arith.constant 1.000000e+00 : f32
      %84 = vector.broadcast %cst_52 : f32 to vector<2x32xf32>
      %85 = arith.subf %84, %80 : vector<2x32xf32>
      %86 = arith.mulf %85, %83 : vector<2x32xf32>
      %87 = arith.mulf %80, %20 : vector<2x32xf32>
      %88 = arith.addf %86, %87 : vector<2x32xf32>
      %c0_53 = arith.constant 0 : index
      %c0_54 = arith.constant 0 : index
      %89 = vector.load %arg14[%c0_53, %c0_54] : memref<2x32xf32, #tpu.memory_space<vmem>>, vector<2x32xf32>
      tpu.vector_store %arg14[%c0_53, %c0_54], %88 {strides = array<i32>} : memref<2x32xf32, #tpu.memory_space<vmem>>, vector<2x32xf32>,
      %c0_55 = arith.constant 0 : index
      %c0_56 = arith.constant 0 : index
      %90 = vector.load %arg13[%c0_55, %c0_56] : memref<2x32xf32, #tpu.memory_space<vmem>>, vector<2x32xf32>
      tpu.vector_store %arg13[%c0_55, %c0_56], %88 {strides = array<i32>} : memref<2x32xf32, #tpu.memory_space<vmem>>, vector<2x32xf32>,
    } else {
    }
    %c0 = arith.constant 0 : index
    %c0_1 = arith.constant 0 : index
    %3 = vector.load %arg14[%c0, %c0_1] : memref<2x32xf32, #tpu.memory_space<vmem>>, vector<2x32xf32>
    %c0_2 = arith.constant 0 : index
    %c0_3 = arith.constant 0 : index
    %4 = vector.load %arg9[%c0_2, %c0_3] : memref<32x32xf32, #tpu.memory_space<vmem>>, vector<32x32xf32>
    %cst = arith.constant dense<0.000000e+00> : vector<2x32xf32>
    %5 = tpu.matmul %3, %4, %cst {dimension_numbers = #tpu.dot_dimension_numbers<[1], [0], [0], [1], [0, 0, 1, 1], [], []>} : vector<2x32xf32>, vector<32x32xf32>, vector<2x32xf32> -> vector<2x32xf32>
    %c0_4 = arith.constant 0 : index
    %c0_5 = arith.constant 0 : index
    %6 = vector.load %arg10[%c0_4, %c0_5] : memref<1x32xf32, #tpu.memory_space<vmem>>, vector<1x32xf32>
    %7 = vector.broadcast %6 : vector<1x32xf32> to vector<2x32xf32>
    %8 = arith.addf %5, %7 : vector<2x32xf32>
    %c0_6 = arith.constant 0 : index
    %c0_7 = arith.constant 0 : index
    %9 = vector.load %arg12[%c0_6, %c0_7] : memref<2x32xf32, #tpu.memory_space<vmem>>, vector<2x32xf32>
    tpu.vector_store %arg12[%c0_6, %c0_7], %8 {strides = array<i32>} : memref<2x32xf32, #tpu.memory_space<vmem>>, vector<2x32xf32>,
    return
  }
  func.func @transform_0(%arg0: i32, %arg1: memref<2xi32, #tpu.memory_space<smem>>) -> (i32, i32) {
    %c0_i32 = arith.constant 0 : i32
    %c0_i32_0 = arith.constant 0 : i32
    %c0_i32_1 = arith.constant 0 : i32
    return %c0_i32, %c0_i32_0 : i32, i32
  }
  func.func @transform_1(%arg0: i32, %arg1: memref<2xi32, #tpu.memory_space<smem>>) -> (i32, i32, i32) {
    %c0_i32 = arith.constant 0 : i32
    %c0_i32_0 = arith.constant 0 : i32
    %c0_i32_1 = arith.constant 0 : i32
    %c0_i32_2 = arith.constant 0 : i32
    return %c0_i32, %c0_i32_0, %c0_i32_1 : i32, i32, i32
  }
  func.func @transform_2(%arg0: i32, %arg1: memref<2xi32, #tpu.memory_space<smem>>) -> (i32, i32, i32) {
    %c0_i32 = arith.constant 0 : i32
    %c0_i32_0 = arith.constant 0 : i32
    %c0_i32_1 = arith.constant 0 : i32
    %c0_i32_2 = arith.constant 0 : i32
    return %c0_i32, %c0_i32_0, %c0_i32_1 : i32, i32, i32
  }
  func.func @transform_3(%arg0: i32, %arg1: memref<2xi32, #tpu.memory_space<smem>>) -> (i32, i32, i32) {
    %c0_i32 = arith.constant 0 : i32
    %c0_i32_0 = arith.constant 0 : i32
    %c0_i32_1 = arith.constant 0 : i32
    %c0_i32_2 = arith.constant 0 : i32
    return %c0_i32, %c0_i32_0, %c0_i32_1 : i32, i32, i32
  }
  func.func @transform_4(%arg0: i32, %arg1: memref<2xi32, #tpu.memory_space<smem>>) -> (i32, i32) {
    %c0_i32 = arith.constant 0 : i32
    %c0_i32_0 = arith.constant 0 : i32
    %c0_i32_1 = arith.constant 0 : i32
    return %c0_i32, %c0_i32_0 : i32, i32
  }
  func.func @transform_5(%arg0: i32, %arg1: memref<2xi32, #tpu.memory_space<smem>>) -> (i32, i32) {
    %c0_i32 = arith.constant 0 : i32
    %c0_i32_0 = arith.constant 0 : i32
    %c0_i32_1 = arith.constant 0 : i32
    return %c0_i32, %c0_i32_0 : i32, i32
  }
  func.func @transform_6(%arg0: i32, %arg1: memref<2xi32, #tpu.memory_space<smem>>) -> (i32, i32) {
    %c0_i32 = arith.constant 0 : i32
    %c0_i32_0 = arith.constant 0 : i32
    %c0_i32_1 = arith.constant 0 : i32
    return %c0_i32, %c0_i32_0 : i32, i32
  }
  func.func @transform_7(%arg0: i32, %arg1: memref<2xi32, #tpu.memory_space<smem>>) -> (i32, i32) {
    %c0_i32 = arith.constant 0 : i32
    %c0_i32_0 = arith.constant 0 : i32
    return %c0_i32, %arg0 : i32, i32
  }
  func.func @transform_8(%arg0: i32, %arg1: memref<2xi32, #tpu.memory_space<smem>>) -> (i32, i32) {
    %c0_i32 = arith.constant 0 : i32
    %c0_i32_0 = arith.constant 0 : i32
    return %c0_i32, %arg0 : i32, i32
  }
  func.func @transform_10(%arg0: i32, %arg1: memref<2xi32, #tpu.memory_space<smem>>) -> (i32, i32) {
    %c0_i32 = arith.constant 0 : i32
    %c0_i32_0 = arith.constant 0 : i32
    return %c0_i32, %arg0 : i32, i32
  }
  func.func @transform_11(%arg0: i32, %arg1: memref<2xi32, #tpu.memory_space<smem>>) -> (i32, i32) {
    %c0_i32 = arith.constant 0 : i32
    %c0_i32_0 = arith.constant 0 : i32
    %c0_i32_1 = arith.constant 0 : i32
    return %c0_i32, %c0_i32_0 : i32, i32
  }
}

</mosaic_0001>

<bundles_post_ra>
// kernel: tpu_custom_call.1
= control target key start
LH: loop header
LB: loop body
LE: loop exit
PB: predicated region body
PF: predicated region fallthrough
CT: control target
= control target key end

     0   :  { %s796_s24 = smov [#allocation6]   ;;  %s966_s0 = inlined_call_operand.hbm [shape: s32[2], index: 0, kind: input, shape index: {}]   ;;  %s967_s1 = inlined_call_operand.hbm [shape: f32[2,32], index: 1, kind: input, shape index: {}]   ;;  %s968_s2 = inlined_call_operand.hbm [shape: f32[2,8,32], index: 2, kind: input, shape index: {}]   ;;  %s969_s3 = inlined_call_operand.hbm [shape: f32[2,8,96], index: 3, kind: input, shape index: {}]   ;;  %s970_s4 = inlined_call_operand.vmem [shape: f32[1,1,32], index: 4, kind: input, shape index: {}]   ;;  %s971_s5 = inlined_call_operand.hbm [shape: f32[32,128], index: 5, kind: input, shape index: {}]   ;;  %s972_s6 = inlined_call_operand.vmem [shape: f32[1,96], index: 6, kind: input, shape index: {}]   ;;  %s973_s7 = inlined_call_operand.vmem [shape: f32[1,96], index: 7, kind: input, shape index: {}]   ;;  %s974_s8 = inlined_call_operand.hbm [shape: f32[32,32], index: 8, kind: input, shape index: {}]   ;;  %s975_s9 = inlined_call_operand.vmem [shape: f32[1,32], index: 9, kind: input, shape index: {}]   ;;  %s976_s10 = inlined_call_operand.hbm [shape: f32[32,96], index: 10, kind: input, shape index: {}]   ;;  %s977_s11 = inlined_call_operand.hbm [shape: f32[2,32], index: 11, kind: output, shape index: {0}]   ;;  %s978_s12 = inlined_call_operand.hbm [shape: f32[2,32], index: 12, kind: output, shape index: {1}]  }
   0x1   :  { %s19_s23 = sshll.u32 %s966_s0, 4  ;;  %s20_s23 = int_to_ptr.hbm [resolvable:$true] %s19_s23 }
   0x2   :  { %22 = dma.hbm_to_smem %s20_s23, 16, %s796_s24, [#allocation5] }
   0x3   :  { %780 = dma.done.wait [#allocation5], 16 }
   0x4   :  { %781 = vsyncadd [#allocation5], 4294967280 }
   0x5   :  { %25 = sfence }
   0x6   :  { %26 = vsyncpa [#allocation8], 0 }
   0x7   :  { %27 = vsyncpa [#allocation11], 0 }
   0x8   :  { %28 = vsyncpa [#allocation14], 0 }
   0x9   :  { %29 = vsyncpa [#allocation9], 0  ;;  %s46_s27 = sshll.u32 %s968_s2, 4  ;;  %s47_s27 = int_to_ptr.hbm [resolvable:$true] %s46_s27 }
   0xa   :  { %30 = vsyncpa [#allocation18], 0  ;;  %s797_s28 = smov [#allocation10]   ;;  %s74_s13 = sshll.u32 %s971_s5, 4  ;;  %s75_s13 = int_to_ptr.hbm [resolvable:$true] %s74_s13 }
   0xb   :  { %s48_s29 = sshll.u32 %s797_s28, 4  ;;  %s798_s14 = smov 128   ;;  %s49_s29 = int_to_ptr.vmem [resolvable:$true] %s48_s29 }
   0xc   :  { %s799_s15 = smov 8   ;;  %s800_s16 = smov [#allocation13]  }
   0xd   :  { %54 = dma.hbm_to_vmem [thread:$0]  %s47_s27, 256, %s49_s29, [#allocation11], %s798_s14, %s798_s14, %s799_s15  }
   0xe   :  { %s76_s17 = sshll.u32 %s800_s16, 4  ;;  %s36_s20 = sshll.u32 %s967_s1, 4  ;;  %s77_s17 = int_to_ptr.vmem [resolvable:$true] %s76_s17  ;;  %s37_s20 = int_to_ptr.hbm [resolvable:$true] %s36_s20 }
   0xf   :  { %82 = dma.hbm_to_vmem [thread:$0]  %s75_s13, 512, %s77_s17, [#allocation14], %s798_s14, %s798_s14, %s799_s15  }
  0x10   :  { %s59_s22 = sshll.u32 %s969_s3, 4  ;;  %s801_s23 = smov [#allocation7]   ;;  %s60_s22 = int_to_ptr.hbm [resolvable:$true] %s59_s22 }
  0x11   :  { %s38_s24 = sshll.u32 %s801_s23, 4  ;;  %s802_s5 = smov [#allocation12]   ;;  %s39_s24 = int_to_ptr.vmem [resolvable:$true] %s38_s24 }
  0x12   :  { %41 = dma.hbm_to_vmem [thread:$0]  %s37_s20, 32, %s39_s24, [#allocation8]  }
  0x13   :  { %s61_s25 = sshll.u32 %s802_s5, 4  ;;  %s91_s28 = sshll.u32 %s974_s8, 4  ;;  %s62_s25 = int_to_ptr.vmem [resolvable:$true] %s61_s25  ;;  %s92_s28 = int_to_ptr.hbm [resolvable:$true] %s91_s28 }
  0x14   :  { %67 = dma.hbm_to_vmem [thread:$0]  %s60_s22, 256, %s62_s25, [#allocation11], %s798_s14, %s798_s14, %s799_s15  }
  0x15   :  { %s803_s1 = smov [#allocation15]  }
  0x16   :  { %s93_s29 = sshll.u32 %s803_s1, 4  ;;  %s94_s29 = int_to_ptr.vmem [resolvable:$true] %s93_s29 }
  0x17   :  { %99 = dma.hbm_to_vmem [thread:$0]  %s92_s28, 512, %s94_s29, [#allocation14], %s798_s14, %s798_s14, %s799_s15  }
  0x18   :  { %782 = dma.done.wait [#allocation8], 32  }
  0x19   :  { %783 = vsyncadd [#allocation8], 4294967264 }
  0x1a   :  { %784 = dma.done.wait [#allocation11], 512  }
  0x1b   :  { %785 = vsyncadd [#allocation11], 4294966784 }
  0x1c   :  { %786 = dma.done.wait [#allocation14], 1024  }
  0x1d   :  { %787 = vsyncadd [#allocation14], 4294966272  ;;  %v162_v0 = vld [vmem:[#allocation13 + $0x18] sm:$0xff]  ;;  %v161_v1 = vld [vmem:[#allocation13 + $0x10] sm:$0xff]  ;;  %vm163_vm0 = vcmask 261120   ;;  %v220_v21 = vlaneseq  ;;  %vm224_vm1 = vcmask 1041409  }
  0x1e   :  { %179 = vmatpush.msra.mxu0 %v162_v0  ;;  %v160_v2 = vld [vmem:[#allocation13 + $0x8] sm:$0xff]  ;;  %v159_v3 = vld [vmem:[#allocation13] sm:$0xff]  ;;  %v895_v4 = vld [vmem:[#allocation7] sm:$0x3]  ;;  %vm227_vm2 = vcmask 58368   ;;  %v804_v28 = vmov 0  }
  0x1f   :  { %v194_v6 = vld [vmem:[#allocation10] sm:$0xff]  ;;  %v195_v9 = vld [vmem:[#allocation10 + $0x8] sm:$0xff]  ;;  %v530_v13 = vld [vmem:[%s970_s4] ss:$0 sm:$0xff]  ;;  %v908_v22 = vand.u32 127, %v220_v21  ;;  %528 = vset.pattern.permute.xlu2 %v804_v28  ;;  %527 = vset.pattern.permute.xlu1 %v804_v28  ;;  %s805_s30 = smov 32  }
  0x20   :  { %180 = vmatpush.msra.mxu0 %v161_v1  ;;  %529 = vset.pattern.permute.xlu0 %v804_v28  ;;  %s126_s13 = sld [smem:[#allocation6]]  ;;  %vm299_vm11 = vcmask 64512   ;;  %s806_s15 = smov [#allocation3]  }
  0x21   :  { %s503_s14 = sld [smem:[#allocation6 + $0x1]]  ;;  %s137_s16 = sshll.u32 %s806_s15, 4  ;;  %s138_s16 = int_to_ptr.vmem [resolvable:$true] %s137_s16 }
  0x22   :  { %181 = vmatpush.msra.mxu0 %v160_v2  ;;  %s807_s17 = smov [#allocation3 + $0x1]   ;;  %s688_s28 = scalar_lea.hbm %s976_s10, 32 }
  0x23   :  { %s923_s18 = sshll.u32 %s807_s17, 4  ;;  %s155_s18 = int_to_ptr.vmem [resolvable:$true] %s923_s18 }
  0x24   :  { %182 = vmatpush.msra.mxu0 %v159_v3 }
  0x25   :  { %504 = vmatmul.msk.f32.vlgmr.msra.gmra.mxu0 %vm163_vm0, %v895_v4 }
  0x26   :  { %s127_s20 = scalar_lea.hbm %s976_s10, %s126_s13 }
  0x27   :  { %s135_s2 = sshll.u32 %s127_s20, 4  ;;  %s142_s23 = scalar_lea.hbm %s976_s10, %s503_s14  ;;  %s136_s2 = int_to_ptr.hbm [resolvable:$true] %s135_s2 }
  0x28   :  { %s152_s24 = sshll.u32 %s142_s23, 4  ;;  %s684_s5 = sshra.s32 %s136_s2, 4  ;;  %s685_s5 = int_to_ptr.hbm [resolvable:$true] %s684_s5  ;;  %s153_s24 = int_to_ptr.hbm [resolvable:$true] %s152_s24 }
  0x29   :  { %s686_s25 = scalar_lea.hbm %s685_s5, 1  ;;  %p689_p1 = scmp.lt.s32.totalorder %s685_s5, %s976_s10 }
  0x2a   :  { %p687_p0 = scmp.ne.s32.totalorder %s685_s5, %s686_s25  ;;  %p690_p2 = scmp.lt.s32.totalorder %s688_s28, %s686_s25 }
  0x2c   :  { %p691_p3 = por %p690_p2, %p689_p1 }
  0x2e   :  { %p692_p4 = pnand %p691_p3, %p687_p0 }
  0xa2   :  { %v899_v5 = vpop.f32.mrf.mxu0 }
  0xa3   :  { %v197_v7 = vrot.slane %v899_v5, 1  ;;  %v198_v8 = vperm.slane %v899_v5, 0 }
  0xa5   :  { %v199_v10 = vperm.slane %v197_v7, 0  ;;  %v202_v11 = vadd.f32 %v198_v8, %v194_v6  ;;  %v531_v7 = vld [vmem:[%s973_s7] ss:$0 sm:$0xff]  ;;  %v292_v8 = vld [vmem:[#allocation12] sm:$0xff] }
  0xa6   :  { %317 = vmatpush.msra.mxu1 %v292_v8 }
  0xa7   :  { %v203_v12 = vadd.f32 %v199_v10, %v195_v9  ;;  %532 = vtanh.f32 %v202_v11  ;;  %v293_v9 = vld [vmem:[#allocation12 + $0x8] sm:$0xff] }
  0xa8   :  { %344 = vmatpush.msra.mxu2 %v293_v9 }
  0xa9   :  { %534 = vtanh.f32 %v203_v12 }
  0xad   :  { %v533_v14 = vpop.eup %532 }
  0xae   :  { %v210_v15 = vmul.f32 %v533_v14, %v530_v13 }
  0xaf   :  { %v535_v17 = vpop.eup %534 }
  0xb0   :  { %v212_v16 = vsel %vm163_vm0, %v210_v15, 0.0  ;;  %v211_v18 = vmul.f32 %v535_v17, %v530_v13 }
  0xb1   :  { %213 = vadd.xlane.f32.xlu0 %v212_v16 }
  0xb2   :  { %v215_v19 = vsel %vm163_vm0, %v211_v18, 0.0 }
  0xb9   :  { %216 = vadd.xlane.f32.xlu0 %v215_v19 }
 0x124   :  { %v214_v20 = vpop.xlane.xlu0 %213 }
 0x125   :  { %v222_v24 = vperm.slane %v214_v20, %v908_v22 }
 0x12c   :  { %v217_v23 = vpop.xlane.xlu0 %216 }
 0x12d   :  { %v223_v25 = vperm.slane %v217_v23, %v908_v22 }
 0x12f   :  { %v225_v26 = vsel %vm224_vm1, %v223_v25, %v222_v24 }
 0x130   :  { %v228_v27 = vsel %vm227_vm2, %v225_v26, -inf }
 0x131   :  { %229 = vmax.xlane.f32.xlu1 %v228_v27 }
 0x1a4   :  { %v230_v29 = vpop.xlane.xlu1 %229 }
 0x1a5   :  { %v232_v30 = vperm.slane %v230_v29, 0  ;;  %v233_v31 = vperm.slane %v230_v29, 1 }
 0x1a7   :  { %v236_v32 = vsub.f32 %v214_v20, %v232_v30  ;;  %v237_v33 = vsub.f32 %v217_v23, %v233_v31 }
 0x1a9   :  { %v238_v34 = vmul.f32 1.442695, %v236_v32  ;;  %v240_v35 = vmul.f32 1.442695, %v237_v33 }
 0x1ab   :  { %536 = vpow2.f32 %v238_v34 }
 0x1ac   :  { %538 = vpow2.f32 %v240_v35 }
 0x1b1   :  { %v537_v36 = vpop.eup %536 }
 0x1b2   :  { %v539_v37 = vpop.eup %538  ;;  %245 = vperm.xlu1 %527, %v537_v36  }
 0x1b3   :  { %248 = vperm.xlu2 %528, %v539_v37  }
 0x20d   :  { %v249_v38 = vpop.permute.xlu2 %248 }
 0x20e   :  { %v251_v40 = vperm.slane %v249_v38, %v908_v22 }
 0x224   :  { %v246_v39 = vpop.permute.xlu1 %245 }
 0x225   :  { %v250_v41 = vperm.slane %v246_v39, %v908_v22 }
 0x227   :  { %v252_v42 = vsel %vm224_vm1, %v251_v40, %v250_v41 }
 0x228   :  { %v254_v43 = vsel %vm227_vm2, %v252_v42, 0.0 }
 0x229   :  { %255 = vadd.xlane.f32.xlu2 %v254_v43 }
 0x29c   :  { %v256_v44 = vpop.xlane.xlu2 %255 }
 0x29d   :  { %v258_v45 = vperm.slane %v256_v44, 0  ;;  %v259_v46 = vperm.slane %v256_v44, 1 }
 0x29f   :  { %540 = vrcp.f32 %v258_v45  ;;  %v273_v53 = vand.u32 2147483648, %v258_v45  ;;  %v288_v54 = vand.u32 2147483648, %v259_v46  ;;  %v271_v56 = vand.u32 2147483647, %v258_v45 }
 0x2a0   :  { %542 = vrcp.f32 %v259_v46  ;;  %v286_v58 = vand.u32 2147483647, %v259_v46  ;;  %vm267_vm5 = vweird.f32 %v258_v45  ;;  %vm282_vm6 = vweird.f32 %v259_v46 }
 0x2a1   :  { %v274_v61 = vor.u32 1.1754944e-38, %v273_v53  ;;  %v289_v62 = vor.u32 1.1754944e-38, %v288_v54  ;;  %vm272_vm9 = vcmp.eq.f32.partialorder %v271_v56, 8.507059e+37 }
 0x2a2   :  { %vm287_vm10 = vcmp.eq.f32.partialorder %v286_v58, 8.507059e+37 }
 0x2a5   :  { %v541_v47 = vpop.eup %540 }
 0x2a6   :  { %v543_v48 = vpop.eup %542  ;;  %v263_v49 = vmul.f32 %v541_v47, %v258_v45  ;;  %vm268_vm3 = vweird.f32 %v541_v47 }
 0x2a7   :  { %v278_v50 = vmul.f32 %v543_v48, %v259_v46  ;;  %vm283_vm4 = vweird.f32 %v543_v48  ;;  %vm269_vm7 = vmor %vm267_vm5, %vm268_vm3 }
 0x2a8   :  { %v264_v51 = vsub.f32 1.0, %v263_v49  ;;  %vm284_vm8 = vmor %vm282_vm6, %vm283_vm4 }
 0x2a9   :  { %v279_v52 = vsub.f32 1.0, %v278_v50 }
 0x2aa   :  { %v265_v55 = vmul.f32 %v541_v47, %v264_v51 }
 0x2ab   :  { %v280_v57 = vmul.f32 %v543_v48, %v279_v52 }
 0x2ac   :  { %v266_v59 = vadd.f32 %v541_v47, %v265_v55 }
 0x2ad   :  { %v281_v60 = vadd.f32 %v543_v48, %v280_v57 }
 0x2ae   :  { %v270_v63 = vsel %vm269_vm7, %v541_v47, %v266_v59 }
 0x2af   :  { %v285_v0 = vsel %vm284_vm8, %v543_v48, %v281_v60  ;;  %v275_v1 = vsel %vm272_vm9, %v274_v61, %v270_v63 }
 0x2b0   :  { %v290_v2 = vsel %vm287_vm10, %v289_v62, %v285_v0  ;;  %v276_v3 = vmul.f32 %v537_v36, %v275_v1 }
 0x2b1   :  { %v291_v6 = vmul.f32 %v539_v37, %v290_v2 }
 0x2b2   :  { %296 = vperm.xlu1 %527, %v276_v3  }
 0x2b3   :  { %324 = vperm.xlu0 %529, %v291_v6  }
 0x2ba   :  { %190 = vrot.lane.b32.xlu1 %v531_v7, %s805_s30 }
 0x324   :  { %v297_v10 = vpop.permute.xlu1 %296 }
 0x325   :  { %v325_v11 = vpop.permute.xlu0 %324  ;;  %v298_v12 = vperm.slane %v297_v10, %v908_v22 }
 0x326   :  { %v326_v13 = vperm.slane %v325_v11, %v908_v22 }
 0x327   :  { %505 = vmatmul.msk.f32.vlgmr.msra.gmra.mxu1 %vm299_vm11, %v298_v12 }
 0x328   :  { %506 = vmatmul.msk.f32.vlgmr.msra.gmra.mxu2 %vm299_vm11, %v326_v13 }
 0x329   :  { %695 = shalt.err (!%p692_p4)  }
 0x32a   :  { %140 = dma.hbm_to_vmem [thread:$0]  %s136_s2, 16, %s138_s16, [#allocation4] }
 0x32b   :  { %s708_s3 = sshra.s32 %s153_s24, 4  ;;  %s709_s3 = int_to_ptr.hbm [resolvable:$true] %s708_s3 }
 0x32c   :  { %v191_v14 = vpop.permute.xlu1 %190  ;;  %s710_s8 = scalar_lea.hbm %s709_s3, 1  ;;  %p713_p6 = scmp.lt.s32.totalorder %s709_s3, %s976_s10 }
 0x32d   :  { %p711_p5 = scmp.ne.s32.totalorder %s709_s3, %s710_s8  ;;  %p714_p7 = scmp.lt.s32.totalorder %s688_s28, %s710_s8 }
 0x32f   :  { %p715_p8 = por %p714_p7, %p713_p6 }
 0x331   :  { %p716_p9 = pnand %p715_p8, %p711_p5 }
 0x333   :  { %719 = shalt.err (!%p716_p9)  }
 0x334   :  { %157 = dma.hbm_to_vmem [thread:$0]  %s153_s24, 16, %s155_s18, [#allocation4 + $0x1]  ;;  %v193_v15 = vadd.f32 %v191_v14, %v899_v5 }
 0x3a4   :  { %v319_v16 = vpop.f32.mrf.mxu1 }
 0x3ab   :  { %v346_v17 = vpop.f32.mrf.mxu2 }
 0x3ac   :  { %788 = dma.done.wait [#allocation4], 16 }
 0x3ad   :  { %789 = vsyncadd [#allocation4], 4294967280  ;;  %406 = vrot.lane.b32.xlu2 %v895_v4, %s805_s30 }
 0x3ae   :  { %790 = dma.done.wait [#allocation4 + $0x1], 16 }
 0x3af   :  { %791 = vsyncadd [#allocation4 + $0x1], 4294967280  ;;  %s808_s13 = smov 96   ;;  %v357_v18 = vrot.slane %v346_v17, 7  ;;  %v354_v19 = vld [vmem:[#allocation3] sm:$0x3] }
 0x3b0   :  { %367 = vrot.lane.b32.xlu0 %v193_v15, %s808_s13  ;;  %v544_v5 = vld [vmem:[%s972_s6] ss:$0 sm:$0xff]  ;;  %s809_s6 = smov 64   ;;  %v421_v49 = vld [vmem:[#allocation15 + $0x10] sm:$0xff]  ;;  %v420_v50 = vld [vmem:[#allocation15 + $0x8] sm:$0xff]  ;;  %s471_s18 = sshll.u32 %s978_s12, 4  ;;  %s472_s18 = int_to_ptr.hbm [resolvable:$true] %s471_s18 }
 0x3b1   :  { %v358_v20 = vsel %vm224_vm1, %v357_v18, %v319_v16  ;;  %v422_v48 = vld [vmem:[#allocation15 + $0x18] sm:$0xff]  ;;  %v419_v51 = vld [vmem:[#allocation15] sm:$0xff]  ;;  %vm415_vm1 = vcmask 254976   ;;  %s811_s20 = smov [#allocation16]   ;;  %s460_s23 = sshll.u32 %s977_s11, 4  ;;  %s461_s23 = int_to_ptr.hbm [resolvable:$true] %s460_s23 }
 0x3b2   :  { %v360_v21 = vadd.f32 %v358_v20, %v354_v19  ;;  %443 = vmatpush.msra.mxu3 %v422_v48  ;;  %v545_v54 = vld [vmem:[%s975_s9] ss:$0 sm:$0xff]  ;;  %s458_s2 = sshll.u32 %s811_s20, 4  ;;  %s459_s2 = int_to_ptr.vmem [resolvable:$true] %s458_s2 }
 0x3b4   :  { %v365_v22 = vadd.f32 %v544_v5, %v360_v21  ;;  %444 = vmatpush.msra.mxu3 %v421_v49 }
 0x3b6   :  { %445 = vmatpush.msra.mxu3 %v420_v50 }
 0x3b8   :  { %390 = vrot.lane.b32.xlu0 %v193_v15, %s805_s30  ;;  %446 = vmatpush.msra.mxu3 %v419_v51  ;;  %s810_s30 = smov [#allocation17]  }
 0x3b9   :  { %s469_s15 = sshll.u32 %s810_s30, 4  ;;  %s470_s15 = int_to_ptr.vmem [resolvable:$true] %s469_s15 }
 0x407   :  { %v407_v42 = vpop.permute.xlu2 %406 }
 0x422   :  { %v368_v23 = vpop.permute.xlu0 %367 }
 0x423   :  { %v370_v24 = vadd.f32 %v368_v23, %v365_v22 }
 0x425   :  { %v507_v4 = vmul.f32 -1.442695, %v370_v24 }
 0x427   :  { %546 = vpow2.f32 %v507_v4 }
 0x42a   :  { %v391_v35 = vpop.permute.xlu0 %390 }
 0x42d   :  { %v547_v25 = vpop.eup %546 }
 0x42e   :  { %v374_v26 = vadd.f32 1.0, %v547_v25 }
 0x430   :  { %548 = vrcp.f32 %v374_v26  ;;  %v386_v30 = vand.u32 2147483648, %v374_v26  ;;  %v384_v32 = vand.u32 2147483647, %v374_v26  ;;  %vm380_vm13 = vweird.f32 %v374_v26 }
 0x432   :  { %v387_v34 = vor.u32 1.1754944e-38, %v386_v30  ;;  %vm385_vm15 = vcmp.eq.f32.partialorder %v384_v32, 8.507059e+37 }
 0x436   :  { %v549_v27 = vpop.eup %548 }
 0x437   :  { %v376_v28 = vmul.f32 %v549_v27, %v374_v26  ;;  %vm381_vm12 = vweird.f32 %v549_v27 }
 0x438   :  { %vm382_vm14 = vmor %vm380_vm13, %vm381_vm12 }
 0x439   :  { %v377_v29 = vsub.f32 1.0, %v376_v28 }
 0x43b   :  { %v378_v31 = vmul.f32 %v549_v27, %v377_v29 }
 0x43d   :  { %v379_v33 = vadd.f32 %v549_v27, %v378_v31 }
 0x43f   :  { %v383_v36 = vsel %vm382_vm14, %v549_v27, %v379_v33 }
 0x440   :  { %v388_v37 = vsel %vm385_vm15, %v387_v34, %v383_v36 }
 0x441   :  { %v393_v38 = vmul.f32 %v391_v35, %v388_v37  ;;  %v400_v43 = vsub.f32 1.0, %v388_v37  ;;  %v409_v45 = vmul.f32 %v407_v42, %v388_v37 }
 0x443   :  { %395 = vrot.lane.b32.xlu1 %v393_v38, %s809_s6 }
 0x4b5   :  { %v396_v39 = vpop.permute.xlu1 %395 }
 0x4b6   :  { %v398_v40 = vadd.f32 %v396_v39, %v365_v22 }
 0x4b8   :  { %550 = vtanh.f32 %v398_v40 }
 0x4be   :  { %v551_v41 = vpop.eup %550 }
 0x4bf   :  { %402 = vrot.lane.b32.xlu1 %v551_v41, %s808_s13 }
 0x531   :  { %v403_v44 = vpop.permute.xlu1 %402 }
 0x532   :  { %v405_v46 = vmul.f32 %v403_v44, %v400_v43 }
 0x534   :  { %v410_v47 = vadd.f32 %v409_v45, %v405_v46 }
 0x536   :  { %412 = vrot.lane.b32.xlu2 %v410_v47, %s808_s13 }
 0x590   :  { %v413_v52 = vpop.permute.xlu2 %412 }
 0x591   :  { %416 = vst.msk [vmem:[#allocation2] sm:$0x3] %vm415_vm1, %v413_v52 }
 0x592   :  { %417 = vst.msk [vmem:[#allocation17] sm:$0x3] %vm415_vm1, %v413_v52 }
 0x593   :  { %474 = dma.vmem_to_hbm [thread:$0]  %s470_s15, 32, %s472_s18, [#allocation18]  }
 0x598   :  { %v418_v53 = vld [vmem:[#allocation2] sm:$0x3] }
 0x599   :  { %508 = vmatmul.msk.f32.vlgmr.msra.gmra.mxu3 %vm163_vm0, %v418_v53 }
 0x61c   :  { %v448_v55 = vpop.f32.mrf.mxu3 }
 0x61d   :  { %v449_v56 = vadd.f32 %v545_v54, %v448_v55 }
 0x61f   :  { %452 = vst.msk [vmem:[#allocation16] sm:$0x3] %vm415_vm1, %v449_v56 }
 0x620   :  { %463 = dma.vmem_to_hbm [thread:$0]  %s459_s2, 32, %s461_s23, [#allocation9]  }
 0x621   :  { %792 = dma.done.wait [#allocation9], 32  }
 0x622   :  { %793 = vsyncadd [#allocation9], 4294967264 }
 0x623   :  { %794 = dma.done.wait [#allocation18], 32  }
 0x624   :  { %795 = vsyncadd [#allocation18], 4294967264 }
 0x625   :  { %483 = vsyncpa [#allocation8], 1 }
 0x626   :  { %484 = vsyncpa [#allocation11], 1 }
 0x627   :  { %485 = vsyncpa [#allocation14], 1 }
 0x628   :  { %486 = vsyncpa [#allocation9], 1 }
 0x629   :  { %487 = vsyncpa [#allocation18], 1 }
 0x62a   :  { %488 = vsyncmov [#allocation4] }
 0x62d   :  { %s489_s9 = vpop.sfrf %488 }
 0x62e   :  { %p509_p10 = scmp.ne.s32.totalorder %s489_s9, 0 }
 0x630   :  { %493 = shalt.err (%p509_p10)  }
 0x631   :  { %495 = vsyncmov [#allocation4 + $0x1] }
 0x634   :  { %s496_s11 = vpop.sfrf %495 }
 0x635   :  { %p510_p11 = scmp.ne.s32.totalorder %s496_s11, 0 }
 0x637   :  { %500 = shalt.err (%p510_p11)  }

</bundles_post_ra>
